<compile_context>
chip_gen: v7x
topology: tpu7x:2x2x1
jax: 0.10.0
libtpu: 0.0.40
codegen_flags: <defaults>
</compile_context>

<pallas_src>
import jax
import jax.numpy as jnp
from jax import lax
from jax.experimental import pallas as pl
from jax.experimental.pallas import tpu as pltpu


def _round_up(v, m):
    return ((v + m - 1) // m) * m


def _select_tiles(M, N, K):
    """Pick (tm, tn, tk).  Full-dim blocks are always legal; partial blocks
    are kept multiples of (8, 128).  Ensures the parallel (i, j) grid has at
    least 2 tiles when feasible so both v7x TensorCores get work."""
    tm, tn, tk = 512, 1024, 512
    if K >= 2048:
        tk = 1024  # fewer reduction steps; longer DMAs hide behind the MXU
    tm = M if M <= tm else tm
    tn = N if N <= tn else tn
    tk = K if K <= tk else tk
    if pl.cdiv(M, tm) * pl.cdiv(N, tn) < 2:
        if N >= 256:
            tn = min(tn, _round_up(-(-N // 2), 128))
        elif M >= 16:
            tm = min(tm, _round_up(-(-M // 2), 8))
    return tm, tn, tk


def _make_addmm_kernel(K, tk, nk):
    """out = bias + A @ B.  K is the innermost grid axis; the f32 output block
    is VMEM-resident across it and used directly as the accumulator."""
    mask_last_k = (K % tk) != 0  # last K block is ragged

    def kernel(x_ref, a_ref, b_ref, o_ref):
        k = pl.program_id(2)

        @pl.when(k == 0)
        def _init():
            # Fused bias: x_ref is (1, tn) (free sublane broadcast) or (tm, tn).
            o_ref[...] = jnp.broadcast_to(
                x_ref[...].astype(jnp.float32), o_ref.shape
            )

        if mask_last_k:
            rem = K - (nk - 1) * tk  # static Python int, 0 < rem < tk

            @pl.when(k == nk - 1)
            def _ragged_tail():
                # Zero the out-of-range K tail of BOTH operands so garbage
                # (possibly NaN) past the array end never reaches the sum.
                ka = lax.broadcasted_iota(jnp.int32, a_ref.shape, 1)
                kb = lax.broadcasted_iota(jnp.int32, b_ref.shape, 0)
                a = jnp.where(ka < rem, a_ref[...], 0)
                b = jnp.where(kb < rem, b_ref[...], 0)
                o_ref[...] += jnp.dot(a, b, preferred_element_type=jnp.float32)

            @pl.when(k != nk - 1)
            def _full_step():
                o_ref[...] += jnp.dot(
                    a_ref[...], b_ref[...], preferred_element_type=jnp.float32
                )
        else:
            o_ref[...] += jnp.dot(
                a_ref[...], b_ref[...], preferred_element_type=jnp.float32
            )

    return kernel


def addmm_pallas(x, mat1, mat2, *, bf16_inputs=None):
    """out = x + mat1 @ mat2 (torch.addmm semantics, x broadcast over rows)."""
    M, K = mat1.shape
    K2, N = mat2.shape
    assert K == K2, (mat1.shape, mat2.shape)

    out_dtype = jnp.result_type(x.dtype, mat1.dtype, mat2.dtype)
    x2 = x.reshape(1, -1) if x.ndim == 1 else x
    assert x2.shape in ((1, N), (M, N)), x.shape

    # bf16 A/B (f32 accumulate) uses the native MXU path and halves A/B HBM
    # traffic; auto-enable only for compute-heavy f32 problems so small calls
    # keep full f32 accuracy.
    if bf16_inputs is None:
        bf16_inputs = (
            mat1.dtype == jnp.float32
            and mat2.dtype == jnp.float32
            and 2 * M * N * K >= (1 << 24)
        )
    a = mat1.astype(jnp.bfloat16) if bf16_inputs else mat1
    b = mat2.astype(jnp.bfloat16) if bf16_inputs else mat2

    tm, tn, tk = _select_tiles(M, N, K)
    nk = pl.cdiv(K, tk)
    grid = (pl.cdiv(M, tm), pl.cdiv(N, tn), nk)

    if x2.shape[0] == 1:
        x_rows = 1
        x_spec = pl.BlockSpec((1, tn), lambda i, j, k: (0, j))
    else:
        x_rows = tm
        x_spec = pl.BlockSpec((tm, tn), lambda i, j, k: (i, j))

    # VMEM budget: A/B/out (and x) are double-buffered by the pipeline.
    # Set an explicit limit with headroom: above the 16 MiB v5e scoped
    # default, comfortably under v7x's 64 MiB physical VMEM.
    dbl_buf_bytes = 2 * (
        tm * tk * a.dtype.itemsize
        + tk * tn * b.dtype.itemsize
        + tm * tn * 4
        + x_rows * tn * x2.dtype.itemsize
    )
    vmem_limit = min(max(int(dbl_buf_bytes * 1.5) + (4 << 20), 32 << 20), 56 << 20)

    out_f32 = pl.pallas_call(
        _make_addmm_kernel(K, tk, nk),
        out_shape=jax.ShapeDtypeStruct((M, N), jnp.float32),
        grid=grid,
        in_specs=[
            x_spec,
            pl.BlockSpec((tm, tk), lambda i, j, k: (i, k)),
            pl.BlockSpec((tk, tn), lambda i, j, k: (k, j)),
        ],
        out_specs=pl.BlockSpec((tm, tn), lambda i, j, k: (i, j)),
        compiler_params=pltpu.CompilerParams(
            dimension_semantics=("parallel", "parallel", "arbitrary"),
            vmem_limit_bytes=vmem_limit,
        ),
        cost_estimate=pl.CostEstimate(
            flops=2 * M * N * K,
            transcendentals=0,
            bytes_accessed=(
                a.dtype.itemsize * M * K
                + b.dtype.itemsize * K * N
                + 4 * M * N
                + x2.dtype.itemsize * x2.size
            ),
        ),
    )(x2, a, b)

    return out_f32 if out_dtype == jnp.float32 else out_f32.astype(out_dtype)


def addmm(x, mat1, mat2, *, force_pallas=False, bf16_inputs=None):
    """torch.addmm equivalent; tiny shapes bypass Pallas (launch overhead)."""
    M, K = mat1.shape
    _, N = mat2.shape
    if not force_pallas and (2 * M * N * K) < (1 << 16):
        x2 = x.reshape(1, -1) if x.ndim == 1 else x
        return x2 + mat1 @ mat2
    return addmm_pallas(x, mat1, mat2, bf16_inputs=bf16_inputs)


if __name__ == "__main__":
    key = jax.random.PRNGKey(0)
    k_x, k_m1, k_m2, k_xb, k_a, k_b = jax.random.split(key, 6)

    # --- shapes from the PyTorch module: x = (1, 2); mat1 = mat2 = (2, 2) ----
    x = jax.random.normal(k_x, (1, 2), dtype=jnp.float32)
    mat1 = jax.random.normal(k_m1, (2, 2), dtype=jnp.float32)
    mat2 = jax.random.normal(k_m2, (2, 2), dtype=jnp.float32)

    out_small = jax.block_until_ready(addmm(x, mat1, mat2, force_pallas=True))
    ref_small = x + mat1 @ mat2
    assert out_small.shape == (2, 2)
    assert jnp.allclose(out_small, ref_small, atol=1e-4, rtol=1e-4)

    # --- larger shape exercising the tiled (M, N, K) grid, bf16 MXU path,
    # --- direct-into-output accumulation, and the >=2-tile parallel grid ----
    M, K, N = 512, 1024, 1024
    xb = jax.random.normal(k_xb, (1, N), dtype=jnp.float32)
    a = jax.random.normal(k_a, (M, K), dtype=jnp.float32)
    b = jax.random.normal(k_b, (K, N), dtype=jnp.float32)

    out_big = jax.block_until_ready(addmm(xb, a, b))
    ref_big = xb + jnp.dot(a, b, precision=jax.lax.Precision.HIGHEST)
    rel_err = jnp.max(jnp.abs(out_big - ref_big)) / jnp.max(jnp.abs(ref_big))
    assert out_big.shape == (M, N)
    assert rel_err < 2e-2, rel_err

    print("KERNEL_OK")
</pallas_src>

<mosaic_0001>
module attributes {stable_mosaic.version = 11 : i64} {
  func.func @kernel(%arg0: i32, %arg1: i32, %arg2: i32, %arg3: memref<1x2xf32, #tpu.memory_space<vmem>>, %arg4: memref<2x2xf32, #tpu.memory_space<vmem>>, %arg5: memref<2x2xf32, #tpu.memory_space<vmem>>, %arg6: memref<2x2xf32, #tpu.memory_space<vmem>>) attributes {dimension_semantics = [#tpu.dimension_semantics<parallel>, #tpu.dimension_semantics<parallel>, #tpu.dimension_semantics<arbitrary>], iteration_bounds = array<i64: 1, 1, 1>, scalar_prefetch = 0 : i64, scratch_operands = 0 : i64, tpu.core_type = #tpu.core_type<tc>, window_params = [{transform_indices = @transform_0, window_bounds = array<i64: 1, 2>}, {transform_indices = @transform_1, window_bounds = array<i64: 2, 2>}, {transform_indices = @transform_2, window_bounds = array<i64: 2, 2>}, {transform_indices = @transform_3, window_bounds = array<i64: 2, 2>}]} {
    %c0_i32 = arith.constant 0 : i32
    %0 = arith.cmpi eq, %arg2, %c0_i32 : i32
    %1 = arith.extui %0 : i1 to i32
    %c0_i32_0 = arith.constant 0 : i32
    %2 = arith.cmpi ne, %1, %c0_i32_0 : i32
    scf.if %2 {
      %c0_8 = arith.constant 0 : index
      %c0_9 = arith.constant 0 : index
      %9 = vector.load %arg3[%c0_8, %c0_9] : memref<1x2xf32, #tpu.memory_space<vmem>>, vector<1x2xf32>
      %10 = vector.shape_cast %9 : vector<1x2xf32> to vector<1x2xf32>
      %11 = vector.broadcast %10 : vector<1x2xf32> to vector<2x2xf32>
      %c0_10 = arith.constant 0 : index
      %c0_11 = arith.constant 0 : index
      %12 = vector.load %arg6[%c0_10, %c0_11] : memref<2x2xf32, #tpu.memory_space<vmem>>, vector<2x2xf32>
      tpu.vector_store %arg6[%c0_10, %c0_11], %11 {strides = array<i32>} : memref<2x2xf32, #tpu.memory_space<vmem>>, vector<2x2xf32>,
    } else {
    }
    %c0 = arith.constant 0 : index
    %c0_1 = arith.constant 0 : index
    %3 = vector.load %arg6[%c0, %c0_1] : memref<2x2xf32, #tpu.memory_space<vmem>>, vector<2x2xf32>
    %c0_2 = arith.constant 0 : index
    %c0_3 = arith.constant 0 : index
    %4 = vector.load %arg4[%c0_2, %c0_3] : memref<2x2xf32, #tpu.memory_space<vmem>>, vector<2x2xf32>
    %c0_4 = arith.constant 0 : index
    %c0_5 = arith.constant 0 : index
    %5 = vector.load %arg5[%c0_4, %c0_5] : memref<2x2xf32, #tpu.memory_space<vmem>>, vector<2x2xf32>
    %cst = arith.constant dense<0.000000e+00> : vector<2x2xf32>
    %6 = tpu.matmul %4, %5, %cst {dimension_numbers = #tpu.dot_dimension_numbers<[1], [0], [0], [1], [0, 0, 1, 1], [], []>} : vector<2x2xf32>, vector<2x2xf32>, vector<2x2xf32> -> vector<2x2xf32>
    %7 = arith.addf %3, %6 : vector<2x2xf32>
    %c0_6 = arith.constant 0 : index
    %c0_7 = arith.constant 0 : index
    %8 = vector.load %arg6[%c0_6, %c0_7] : memref<2x2xf32, #tpu.memory_space<vmem>>, vector<2x2xf32>
    tpu.vector_store %arg6[%c0_6, %c0_7], %7 {strides = array<i32>} : memref<2x2xf32, #tpu.memory_space<vmem>>, vector<2x2xf32>,
    return
  }
  func.func @transform_0(%arg0: i32, %arg1: i32, %arg2: i32) -> (i32, i32) {
    %c0_i32 = arith.constant 0 : i32
    %c0_i32_0 = arith.constant 0 : i32
    return %c0_i32, %arg1 : i32, i32
  }
  func.func @transform_1(%arg0: i32, %arg1: i32, %arg2: i32) -> (i32, i32) {
    %c0_i32 = arith.constant 0 : i32
    return %arg0, %arg2 : i32, i32
  }
  func.func @transform_2(%arg0: i32, %arg1: i32, %arg2: i32) -> (i32, i32) {
    %c0_i32 = arith.constant 0 : i32
    return %arg2, %arg1 : i32, i32
  }
  func.func @transform_3(%arg0: i32, %arg1: i32, %arg2: i32) -> (i32, i32) {
    %c0_i32 = arith.constant 0 : i32
    return %arg0, %arg1 : i32, i32
  }
}

</mosaic_0001>

<bundles_post_ra>
// kernel: tpu_custom_call.1
= control target key start
LH: loop header
LB: loop body
LE: loop exit
PB: predicated region body
PF: predicated region fallthrough
CT: control target
= control target key end

     0   :  { %8 = vsyncpa [#allocation3], 0  ;;  %s257_s0 = inlined_call_operand.hbm [shape: f32[1,2], index: 0, kind: input, shape index: {}]   ;;  %s258_s1 = inlined_call_operand.vmem [shape: f32[2,2], index: 1, kind: input, shape index: {}]   ;;  %s259_s2 = inlined_call_operand.vmem [shape: f32[2,2], index: 2, kind: input, shape index: {}]   ;;  %s260_s3 = inlined_call_operand.hbm [shape: f32[2,2], index: 3, kind: output, shape index: {}]  }
   0x1   :  { %9 = vsyncpa [#allocation4], 0  ;;  %s201_s12 = smov [#allocation2]   ;;  %s153_s16 = scalar_lea.hbm %s257_s0, 16 }
   0x2   :  { %s16_s13 = sshll.u32 %s201_s12, 4  ;;  %p154_p0 = scmp.ne.s32.totalorder %s257_s0, %s153_s16  ;;  %s17_s13 = int_to_ptr.vmem [resolvable:$true] %s16_s13 }
   0x3   :  { %p157_p1 = scmp.lt.u32.totalorder %s153_s16, %s257_s0 }
   0x5   :  { %p159_p2 = pnand %p157_p1, %p154_p0 }
   0x7   :  { %162 = shalt.err (!%p159_p2)
}
   0x8   :  { %s163_s21 = scalar_lea.vmem %s17_s13, 16  ;;  %s167_s22 = scalar_lea.vmem %s17_s13, 32 }
   0x9   :  { %p164_p3 = scmp.ne.s32.totalorder %s17_s13, %s163_s21  ;;  %p168_p4 = scmp.lt.s32.totalorder %s17_s13, %s17_s13 }
   0xa   :  { %p169_p5 = scmp.lt.s32.totalorder %s167_s22, %s163_s21 }
   0xc   :  { %p170_p6 = por %p169_p5, %p168_p4 }
   0xe   :  { %p171_p7 = pnand %p170_p6, %p164_p3 }
  0x10   :  { %174 = shalt.err (!%p171_p7)
}
  0x11   :  { %19 = dma.hbm_to_vmem [thread:$0]  %s257_s0, 16, %s17_s13, [#allocation3]  }
  0x12   :  { %197 = dma.done.wait [#allocation3], 16  }
  0x13   :  { %198 = vsyncadd [#allocation3], 4294967280  ;;  %v202_v0 = vmov 0.0   ;;  %vm203_vm0 = vmmov 0   ;;  %vm38_vm1 = vcmask 9216   ;;  %vm47_vm2 = vcmask 1041408  }
  0x14   :  { %144 = vmatprep.subr.mxu0 %v202_v0  ;;  %146 = vmatprep.mubr.msk.f32.mxu0 %vm203_vm0, %v202_v0  ;;  %vm43_vm3 = vcmask 15360   ;;  %v139_v1 = vld [vmem:[#allocation2] ss:$0 sm:$0xff]  ;;  %v42_v2 = vld [vmem:[%s259_s2] sm:$0x3]  ;;  %s204_s0 = smov [#allocation5]  }
  0x15   :  { %v41_v3 = vld [vmem:[%s258_s1] sm:$0x3]  ;;  %39 = vst.msk [vmem:[#allocation5] sm:$0x3] %vm38_vm1, %v139_v1  ;;  %145 = vmatpush3.msk.msra.mxu0 %vm47_vm2, %v42_v2  ;;  %s130_s29 = sshll.u32 %s204_s0, 4  ;;  %s131_s29 = int_to_ptr.vmem [resolvable:$true] %s130_s29 }
  0x16   :  { %147 = vmatmul.mubr.msk.f32.vlgmr.msra.gmra.mrb[0].mxu0 %vm43_vm3, %v41_v3  ;;  %s175_s30 = scalar_lea.vmem %s131_s29, 32  ;;  %p180_p9 = scmp.lt.s32.totalorder %s131_s29, %s131_s29 }
  0x17   :  { %p176_p8 = scmp.ne.s32.totalorder %s131_s29, %s175_s30  ;;  %p181_p10 = scmp.lt.s32.totalorder %s175_s30, %s175_s30 }
  0x19   :  { %p182_p11 = por %p181_p10, %p180_p9 }
  0x1b   :  { %p183_p12 = pnand %p182_p11, %p176_p8 }
  0x1c   :  { %v40_v4 = vld [vmem:[#allocation5] sm:$0x3] }
  0xe9   :  { %v117_v5 = vpop.f32.mrb[0].mxu0 }
  0xea   :  { %v121_v6 = vadd.f32 %v117_v5, %v40_v4  ;;  %v148_v7 = vpop.f32.mrb[1].mxu0 }
  0xec   :  { %123 = vst.msk [vmem:[#allocation5] sm:$0x3] %vm38_vm1, %v121_v6 }
  0xed   :  { %186 = shalt.err (!%p183_p12)
}
  0xee   :  { %s187_s4 = scalar_lea.hbm %s260_s3, 32 }
  0xef   :  { %p188_p13 = scmp.ne.s32.totalorder %s260_s3, %s187_s4  ;;  %p191_p0 = scmp.lt.u32.totalorder %s187_s4, %s260_s3 }
  0xf1   :  { %p193_p1 = pnand %p191_p0, %p188_p13 }
  0xf3   :  { %196 = shalt.err (!%p193_p1)
}
  0xf4   :  { %133 = dma.vmem_to_hbm [thread:$0]  %s131_s29, 32, %s260_s3, [#allocation4]  }
  0xf5   :  { %199 = dma.done.wait [#allocation4], 32  }
  0xf6   :  { %200 = vsyncadd [#allocation4], 4294967264 }
  0xf7   :  { %137 = vsyncpa [#allocation3], 1 }
  0xf8   :  { %138 = vsyncpa [#allocation4], 1 }

</bundles_post_ra>
